<compile_context>
chip_gen: v5e
topology: v5e:2x2
jax: 0.10.0
libtpu: 0.0.40
codegen_flags: <defaults>
</compile_context>

<pallas_src>
import functools

import jax
import jax.numpy as jnp
from jax import lax
from jax.experimental import pallas as pl
from jax.experimental.pallas import tpu as pltpu

_INV_SQRT2 = 0.7071067811865476  # Python literal -> no captured jaxpr constant


# --------------------------------------------------------------------------- #
# Kernel body
# --------------------------------------------------------------------------- #
def _lmhead_kernel(x_ref, w1_ref, b1_ref, g_ref, beta_ref, w2_ref, b2_ref,
                   o_ref, h_scratch, *, eps, inv_h):
    j = pl.program_id(1)

    # Dense -> GELU -> LayerNorm once per token tile, cached across the
    # (sequential, "arbitrary") vocab axis.
    @pl.when(j == 0)
    def _():
        # bf16 x bf16 -> f32 on the MXU.
        h = jnp.dot(x_ref[...], w1_ref[...], preferred_element_type=jnp.float32)
        h = h + b1_ref[...]
        # Exact (erf-based) GELU, matching torch.nn.GELU() default.
        h = 0.5 * h * (1.0 + lax.erf(h * _INV_SQRT2))
        # Single-pass LayerNorm stats: var = E[h^2] - E[h]^2 (one sweep over
        # the (tm, H) tile instead of two -- the j==0 step is the long pole).
        s1 = jnp.sum(h, axis=-1, keepdims=True)
        s2 = jnp.sum(h * h, axis=-1, keepdims=True)
        mean = s1 * inv_h
        var = jnp.maximum(s2 * inv_h - mean * mean, 0.0)
        h = (h - mean) * lax.rsqrt(var + eps)
        h = h * g_ref[...] + beta_ref[...]
        h_scratch[...] = h.astype(h_scratch.dtype)   # cache in bf16

    # Decoder matmul for this vocab tile (bf16 x bf16 -> f32).
    logits = jnp.dot(h_scratch[...], w2_ref[...],
                     preferred_element_type=jnp.float32)
    o_ref[...] = (logits + b2_ref[...]).astype(o_ref.dtype)


# --------------------------------------------------------------------------- #
# Tile / VMEM planning helpers
# --------------------------------------------------------------------------- #
def _round_up(x, m):
    return ((x + m - 1) // m) * m


def _tpu_hw_info():
    """Returns (physical VMEM bytes per core, megacore?, v5e?)."""
    vmem = None
    try:
        vmem = int(pltpu.get_tpu_info().vmem_capacity_bytes)
    except Exception:  # hardware query unavailable (e.g. old build / no TPU)
        vmem = None
    kind = ""
    try:
        kind = jax.devices()[0].device_kind.lower()
    except Exception:
        kind = ""
    is_v7 = "v7" in kind
    is_v5e = ("v5e" in kind) or ("v5 lite" in kind) or ("v5litepod" in kind)
    if vmem is None:
        vmem = (64 << 20) if is_v7 else (128 << 20)
    # Chips with 2 TensorCores sharing HBM (split the "parallel" token axis).
    megacore = is_v7 or ("v4" in kind)
    return vmem, megacore, is_v5e


def _pipeline_mode_supported():
    """True iff this JAX build accepts BlockSpec(pipeline_mode=pl.Buffered(k))."""
    if not hasattr(pl, "Buffered"):
        return False
    try:
        pl.BlockSpec((8, 128), lambda i, j: (0, 0), pipeline_mode=pl.Buffered(1))
        pl.BlockSpec((8, 128), lambda i, j: (0, 0), pipeline_mode=pl.Buffered(3))
    except (TypeError, ValueError):
        return False
    return True


def _vmem_footprint(tm, tv, H, *, out_bytes, w1_bufs, w2_bufs):
    """Approximate VMEM bytes for one grid step (bf16 weights/activations)."""
    return (2 * tm * H * 2                 # x tile, double-buffered, bf16
            + w1_bufs * H * H * 2          # W1 (bf16, [in, out])
            + w2_bufs * H * tv * 2         # W2 tile, bf16
            + 2 * tm * tv * out_bytes      # output tile, double-buffered
            + tm * H * 2                   # h scratch, bf16
            + 8 * H * 4 + 4 * tv * 4)      # b1 / gamma / beta / b2 (small)


def _choose_tm(N, H, tv, budget_bytes, *, out_bytes, w1_bufs, w2_bufs,
               megacore):
    """Largest token tile (multiple of 16) whose footprint fits the budget."""
    n16 = _round_up(max(N, 16), 16)
    if megacore:
        # v7x: 2 TCs share HBM.  Split the token ("parallel") axis but keep
        # tiles >= ~1024 tokens so the per-tile W2 arithmetic intensity stays
        # MXU-bound on the halved per-TC bandwidth.
        if n16 <= 1024:
            cap = n16
        else:
            cap = min(2048, max(1024, _round_up(-(-n16 // 2), 16)))
    else:
        # Single TensorCore (v5e/v6e): maximize W2 reuse; never split just
        # for "megacore".
        cap = min(2048, n16)
    tm = cap
    while tm > 16 and _vmem_footprint(tm, tv, H, out_bytes=out_bytes,
                                      w1_bufs=w1_bufs,
                                      w2_bufs=w2_bufs) > budget_bytes:
        tm = max(16, _round_up(tm // 2, 16))
    if megacore and n16 > tm:
        # Keep the token-tile count even so both TensorCores get equal work.
        tiles = -(-n16 // tm)
        if tiles % 2:
            tiles += 1
            tm = max(16, _round_up(-(-n16 // tiles), 16))
    return tm


# --------------------------------------------------------------------------- #
# pallas_call builder
# --------------------------------------------------------------------------- #
def _build_call(*, H, Np, Vp, tm, tv, eps, inv_h, out_dtype, vmem_limit,
                use_pm, w2_depth):
    def const_spec(shape):
        # W1 / b1 / gamma / beta never change block index; one VMEM buffer is
        # enough (saves a W1-sized double buffer -- matters most on v7x).
        if use_pm:
            return pl.BlockSpec(shape, lambda i, j: (0, 0),
                                pipeline_mode=pl.Buffered(1))
        return pl.BlockSpec(shape, lambda i, j: (0, 0))

    if use_pm and w2_depth > 2:
        # Deeper W2 pipeline: lets prefetch run ahead across the long j==0
        # prologue step and across token-tile boundaries.
        w2_spec = pl.BlockSpec((H, tv), lambda i, j: (0, j),
                               pipeline_mode=pl.Buffered(w2_depth))
    else:
        w2_spec = pl.BlockSpec((H, tv), lambda i, j: (0, j))

    kernel = functools.partial(_lmhead_kernel, eps=float(eps),
                               inv_h=float(inv_h))

    return pl.pallas_call(
        kernel,
        out_shape=jax.ShapeDtypeStruct((Np, Vp), out_dtype),
        grid_spec=pltpu.PrefetchScalarGridSpec(
            num_scalar_prefetch=0,
            # Token axis first ("parallel"), vocab axis last ("arbitrary").
            # The j==0 h-cache relies on the vocab axis being iterated
            # sequentially per token tile -- never mark it "parallel".
            grid=(Np // tm, Vp // tv),
            in_specs=[
                pl.BlockSpec((tm, H), lambda i, j: (i, 0)),   # x tile (bf16)
                const_spec((H, H)),                           # W1 (bf16, [in,out])
                const_spec((1, H)),                           # b1 (f32)
                const_spec((1, H)),                           # LN gamma (f32)
                const_spec((1, H)),                           # LN beta  (f32)
                w2_spec,                                      # W2 tile (bf16)
                pl.BlockSpec((1, tv), lambda i, j: (0, j)),   # b2 / tied bias (f32)
            ],
            out_specs=pl.BlockSpec((tm, tv), lambda i, j: (i, j)),
            scratch_shapes=[pltpu.VMEM((tm, H), jnp.bfloat16)],
        ),
        compiler_params=pltpu.CompilerParams(
            dimension_semantics=("parallel", "arbitrary"),
            vmem_limit_bytes=int(vmem_limit)),
    )


# --------------------------------------------------------------------------- #
# Public wrapper
# --------------------------------------------------------------------------- #
def lm_head_pallas(features, params, *, eps=1e-5, tm=None, tv=None,
                   out_dtype=jnp.bfloat16, vmem_budget_bytes=None):
    """features: [B, S, H].  params: dict (see init_params).  Returns [B, S, V].

    out_dtype defaults to bf16: the N x V logits writeback dominates HBM
    traffic, and bf16 output keeps the decoder phase MXU-bound on v6e/v7x.
    Pass jnp.float32 if the consumer needs full-precision logits.
    """
    B, S, H = features.shape
    V = params["w2"].shape[1]
    N = B * S
    out_dtype = jnp.dtype(out_dtype)
    out_bytes = out_dtype.itemsize

    phys_vmem, megacore, is_v5e = _tpu_hw_info()
    if vmem_budget_bytes is None:
        # Generous headroom under the physical ceiling: ~44 MiB on v7x's
        # 64 MiB, ~92 MiB on v5e/v6e's 128 MiB.
        vmem_budget_bytes = min(int(phys_vmem * 0.72), phys_vmem - (16 << 20))
    vmem_budget_bytes = max(int(vmem_budget_bytes), 8 << 20)

    use_pm = _pipeline_mode_supported()

    # Stream activations and the big weights in bf16 (W2 dominates HBM
    # traffic); keep the small LN / bias params in f32.
    x = features.reshape(N, H).astype(jnp.bfloat16)
    w1 = params["w1"].astype(jnp.bfloat16)
    w2 = params["w2"].astype(jnp.bfloat16)
    b1 = params["b1"].reshape(1, H).astype(jnp.float32)
    gamma = params["gamma"].reshape(1, H).astype(jnp.float32)
    beta = params["beta"].reshape(1, H).astype(jnp.float32)
    b2 = params["b2"].reshape(1, V).astype(jnp.float32)

    def run(pipeline_mode):
        # Buffer counts used for the VMEM plan must match what the pipeline
        # will actually allocate (single- vs double-buffered W1, W2 depth).
        w1_bufs = 1 if pipeline_mode else 2
        w2_bufs = 3 if pipeline_mode else 2

        # Vocab tile: lane-dense multiple of 128.  512 on v5e (a 512-wide MXU
        # step is already ~5 us there); 1024 on v6e/v7x to amortize the
        # ~0.35 us per-grid-step overhead and enlarge W2 DMAs / output stores.
        tv_eff = tv if tv is not None else (512 if is_v5e else 1024)
        tv_eff = min(_round_up(max(tv_eff, 128), 128), _round_up(V, 128))

        if tm is None:
            tm_eff = _choose_tm(N, H, tv_eff, vmem_budget_bytes,
                                out_bytes=out_bytes, w1_bufs=w1_bufs,
                                w2_bufs=w2_bufs, megacore=megacore)
        else:
            tm_eff = _round_up(min(tm, _round_up(N, 16)), 16)

        # Pad tokens / vocab to tile multiples; padding is sliced off below.
        Np, Vp = _round_up(N, tm_eff), _round_up(V, tv_eff)
        xx = jnp.pad(x, ((0, Np - N), (0, 0))) if Np != N else x
        if Vp != V:
            ww2 = jnp.pad(w2, ((0, 0), (0, Vp - V)))
            bb2 = jnp.pad(b2, ((0, 0), (0, Vp - V)))
        else:
            ww2, bb2 = w2, b2

        need = _vmem_footprint(tm_eff, tv_eff, H, out_bytes=out_bytes,
                               w1_bufs=w1_bufs, w2_bufs=w2_bufs)
        # Scoped-VMEM limit: enough for the plan plus slack, never above the
        # chip's physical VMEM (64 MiB per TC on v7x, 128 MiB on v5e/v6e).
        vmem_limit = min(phys_vmem - (2 << 20),
                         max(int(need * 1.25) + (2 << 20), 32 << 20))

        w2_depth = min(3, max(2, Vp // tv_eff)) if pipeline_mode else 2
        call = _build_call(H=H, Np=Np, Vp=Vp, tm=tm_eff, tv=tv_eff, eps=eps,
                           inv_h=1.0 / H, out_dtype=out_dtype,
                           vmem_limit=vmem_limit, use_pm=pipeline_mode,
                           w2_depth=w2_depth)
        return call(xx, w1, b1, gamma, beta, ww2, bb2)

    if use_pm:
        try:
            out = run(True)
        except (NotImplementedError, pltpu.LoweringException):
            # Only the pipeline_mode feature being rejected by Mosaic falls
            # back; unrelated errors propagate.
            out = run(False)
    else:
        out = run(False)

    return out[:N, :V].reshape(B, S, V)


# --------------------------------------------------------------------------- #
# Reference + params
# --------------------------------------------------------------------------- #
def lm_head_reference(features, params, *, eps=1e-5):
    x = features.astype(jnp.float32)
    h = x @ params["w1"] + params["b1"]
    h = 0.5 * h * (1.0 + lax.erf(h / jnp.sqrt(2.0)))
    mean = jnp.mean(h, axis=-1, keepdims=True)
    var = jnp.mean(jnp.square(h - mean), axis=-1, keepdims=True)
    h = (h - mean) * lax.rsqrt(var + eps)
    h = h * params["gamma"] + params["beta"]
    return h @ params["w2"] + params["b2"]


def init_params(key, hidden_size, vocab_size):
    k1, k2, k3, _ = jax.random.split(key, 4)
    scale1 = 1.0 / jnp.sqrt(hidden_size)
    # Weights stored as [in, out] (transposed relative to torch's [out, in]).
    return {
        "w1": jax.random.uniform(k1, (hidden_size, hidden_size), jnp.float32,
                                 -scale1, scale1),
        "b1": jax.random.uniform(k2, (hidden_size,), jnp.float32, -scale1, scale1),
        "gamma": jnp.ones((hidden_size,), jnp.float32),
        "beta": jnp.zeros((hidden_size,), jnp.float32),
        "w2": jax.random.uniform(k3, (hidden_size, vocab_size), jnp.float32,
                                 -scale1, scale1),
        "b2": jnp.zeros((vocab_size,), jnp.float32),  # tied decoder bias (zeros)
    }


if __name__ == "__main__":
    B, S, H, V = 2, 8, 32, 256   # small: batch=2, seq=8, hidden=32, vocab=256
    key = jax.random.PRNGKey(0)
    kx, kp = jax.random.split(key)

    features = jax.random.normal(kx, (B, S, H), jnp.float32)
    params = init_params(kp, H, V)

    out = lm_head_pallas(features, params, eps=1e-5)   # bf16 logits by default
    out = jax.block_until_ready(out)

    ref = lm_head_reference(features, params, eps=1e-5)
    assert out.shape == (B, S, V)
    # bf16 weight/activation streaming + bf16 logits -> looser tolerance vs
    # the f32 reference.
    out_f32 = out.astype(jnp.float32)
    max_err = float(jnp.max(jnp.abs(out_f32 - ref)))
    assert jnp.allclose(out_f32, ref, atol=7.5e-2, rtol=7.5e-2), (
        f"mismatch vs reference (max abs err {max_err})")

    print("KERNEL_OK")
</pallas_src>

<mosaic_0001>
module attributes {stable_mosaic.version = 11 : i64} {
  func.func @_lmhead_kernel(%arg0: i32, %arg1: i32, %arg2: memref<16x32xbf16, #tpu.memory_space<vmem>>, %arg3: memref<32x32xbf16, #tpu.memory_space<vmem>>, %arg4: memref<1x32xf32, #tpu.memory_space<vmem>>, %arg5: memref<1x32xf32, #tpu.memory_space<vmem>>, %arg6: memref<1x32xf32, #tpu.memory_space<vmem>>, %arg7: memref<32x256xbf16, #tpu.memory_space<vmem>>, %arg8: memref<1x256xf32, #tpu.memory_space<vmem>>, %arg9: memref<16x256xbf16, #tpu.memory_space<vmem>>, %arg10: memref<16x32xbf16, #tpu.memory_space<vmem>>) attributes {dimension_semantics = [#tpu.dimension_semantics<parallel>, #tpu.dimension_semantics<arbitrary>], iteration_bounds = array<i64: 1, 1>, scalar_prefetch = 0 : i64, scratch_operands = 1 : i64, tpu.core_type = #tpu.core_type<tc>, window_params = [{transform_indices = @transform_0, window_bounds = array<i64: 16, 32>}, {pipeline_mode = #tpu.pipeline_mode<synchronous>, transform_indices = @transform_1, window_bounds = array<i64: 32, 32>}, {pipeline_mode = #tpu.pipeline_mode<synchronous>, transform_indices = @transform_2, window_bounds = array<i64: 1, 32>}, {pipeline_mode = #tpu.pipeline_mode<synchronous>, transform_indices = @transform_3, window_bounds = array<i64: 1, 32>}, {pipeline_mode = #tpu.pipeline_mode<synchronous>, transform_indices = @transform_4, window_bounds = array<i64: 1, 32>}, {transform_indices = @transform_5, window_bounds = array<i64: 32, 256>}, {transform_indices = @transform_6, window_bounds = array<i64: 1, 256>}, {transform_indices = @transform_7, window_bounds = array<i64: 16, 256>}]} {
    %c0_i32 = arith.constant 0 : i32
    %0 = arith.cmpi eq, %arg1, %c0_i32 : i32
    %1 = arith.extui %0 : i1 to i32
    %c0_i32_0 = arith.constant 0 : i32
    %2 = arith.cmpi ne, %1, %c0_i32_0 : i32
    scf.if %2 {
      %c0_8 = arith.constant 0 : index
      %c0_9 = arith.constant 0 : index
      %11 = vector.load %arg2[%c0_8, %c0_9] : memref<16x32xbf16, #tpu.memory_space<vmem>>, vector<16x32xbf16>
      %c0_10 = arith.constant 0 : index
      %c0_11 = arith.constant 0 : index
      %12 = vector.load %arg3[%c0_10, %c0_11] : memref<32x32xbf16, #tpu.memory_space<vmem>>, vector<32x32xbf16>
      %cst_12 = arith.constant dense<0.000000e+00> : vector<16x32xf32>
      %13 = tpu.matmul %11, %12, %cst_12 {dimension_numbers = #tpu.dot_dimension_numbers<[1], [0], [0], [1], [0, 0, 1, 1], [], []>} : vector<16x32xbf16>, vector<32x32xbf16>, vector<16x32xf32> -> vector<16x32xf32>
      %c0_13 = arith.constant 0 : index
      %c0_14 = arith.constant 0 : index
      %14 = vector.load %arg4[%c0_13, %c0_14] : memref<1x32xf32, #tpu.memory_space<vmem>>, vector<1x32xf32>
      %15 = vector.broadcast %14 : vector<1x32xf32> to vector<16x32xf32>
      %16 = arith.addf %13, %15 : vector<16x32xf32>
      %cst_15 = arith.constant 5.000000e-01 : f32
      %17 = vector.broadcast %cst_15 : f32 to vector<16x32xf32>
      %18 = arith.mulf %17, %16 : vector<16x32xf32>
      %cst_16 = arith.constant 0.707106769 : f32
      %19 = vector.broadcast %cst_16 : f32 to vector<16x32xf32>
      %20 = arith.mulf %16, %19 : vector<16x32xf32>
      %21 = math.erf %20 : vector<16x32xf32>
      %cst_17 = arith.constant 1.000000e+00 : f32
      %22 = vector.broadcast %cst_17 : f32 to vector<16x32xf32>
      %23 = arith.addf %22, %21 : vector<16x32xf32>
      %24 = arith.mulf %18, %23 : vector<16x32xf32>
      %cst_18 = arith.constant dense<0.000000e+00> : vector<16xf32>
      %25 = vector.multi_reduction <add>, %24, %cst_18 [1] : vector<16x32xf32> to vector<16xf32>
      %26 = vector.shape_cast %25 : vector<16xf32> to vector<16x1xf32>
      %27 = arith.mulf %24, %24 : vector<16x32xf32>
      %cst_19 = arith.constant dense<0.000000e+00> : vector<16xf32>
      %28 = vector.multi_reduction <add>, %27, %cst_19 [1] : vector<16x32xf32> to vector<16xf32>
      %29 = vector.shape_cast %28 : vector<16xf32> to vector<16x1xf32>
      %cst_20 = arith.constant 3.125000e-02 : f32
      %30 = vector.broadcast %cst_20 : f32 to vector<16x1xf32>
      %31 = arith.mulf %26, %30 : vector<16x1xf32>
      %cst_21 = arith.constant 3.125000e-02 : f32
      %32 = vector.broadcast %cst_21 : f32 to vector<16x1xf32>
      %33 = arith.mulf %29, %32 : vector<16x1xf32>
      %34 = arith.mulf %31, %31 : vector<16x1xf32>
      %35 = arith.subf %33, %34 : vector<16x1xf32>
      %cst_22 = arith.constant 0.000000e+00 : f32
      %36 = vector.broadcast %cst_22 : f32 to vector<16x1xf32>
      %37 = arith.maximumf %35, %36 : vector<16x1xf32>
      %38 = vector.broadcast %31 : vector<16x1xf32> to vector<16x32xf32>
      %39 = arith.subf %24, %38 : vector<16x32xf32>
      %cst_23 = arith.constant 9.99999974E-6 : f32
      %40 = vector.broadcast %cst_23 : f32 to vector<16x1xf32>
      %41 = arith.addf %37, %40 : vector<16x1xf32>
      %42 = math.rsqrt %41 : vector<16x1xf32>
      %43 = vector.broadcast %42 : vector<16x1xf32> to vector<16x32xf32>
      %44 = arith.mulf %39, %43 : vector<16x32xf32>
      %c0_24 = arith.constant 0 : index
      %c0_25 = arith.constant 0 : index
      %45 = vector.load %arg5[%c0_24, %c0_25] : memref<1x32xf32, #tpu.memory_space<vmem>>, vector<1x32xf32>
      %46 = vector.broadcast %45 : vector<1x32xf32> to vector<16x32xf32>
      %47 = arith.mulf %44, %46 : vector<16x32xf32>
      %c0_26 = arith.constant 0 : index
      %c0_27 = arith.constant 0 : index
      %48 = vector.load %arg6[%c0_26, %c0_27] : memref<1x32xf32, #tpu.memory_space<vmem>>, vector<1x32xf32>
      %49 = vector.broadcast %48 : vector<1x32xf32> to vector<16x32xf32>
      %50 = arith.addf %47, %49 : vector<16x32xf32>
      %51 = arith.truncf %50 : vector<16x32xf32> to vector<16x32xbf16>
      %c0_28 = arith.constant 0 : index
      %c0_29 = arith.constant 0 : index
      %52 = vector.load %arg10[%c0_28, %c0_29] : memref<16x32xbf16, #tpu.memory_space<vmem>>, vector<16x32xbf16>
      tpu.vector_store %arg10[%c0_28, %c0_29], %51 {strides = array<i32>} : memref<16x32xbf16, #tpu.memory_space<vmem>>, vector<16x32xbf16>,
    } else {
    }
    %c0 = arith.constant 0 : index
    %c0_1 = arith.constant 0 : index
    %3 = vector.load %arg10[%c0, %c0_1] : memref<16x32xbf16, #tpu.memory_space<vmem>>, vector<16x32xbf16>
    %c0_2 = arith.constant 0 : index
    %c0_3 = arith.constant 0 : index
    %4 = vector.load %arg7[%c0_2, %c0_3] : memref<32x256xbf16, #tpu.memory_space<vmem>>, vector<32x256xbf16>
    %cst = arith.constant dense<0.000000e+00> : vector<16x256xf32>
    %5 = tpu.matmul %3, %4, %cst {dimension_numbers = #tpu.dot_dimension_numbers<[1], [0], [0], [1], [0, 0, 1, 1], [], []>} : vector<16x32xbf16>, vector<32x256xbf16>, vector<16x256xf32> -> vector<16x256xf32>
    %c0_4 = arith.constant 0 : index
    %c0_5 = arith.constant 0 : index
    %6 = vector.load %arg8[%c0_4, %c0_5] : memref<1x256xf32, #tpu.memory_space<vmem>>, vector<1x256xf32>
    %7 = vector.broadcast %6 : vector<1x256xf32> to vector<16x256xf32>
    %8 = arith.addf %5, %7 : vector<16x256xf32>
    %9 = arith.truncf %8 : vector<16x256xf32> to vector<16x256xbf16>
    %c0_6 = arith.constant 0 : index
    %c0_7 = arith.constant 0 : index
    %10 = vector.load %arg9[%c0_6, %c0_7] : memref<16x256xbf16, #tpu.memory_space<vmem>>, vector<16x256xbf16>
    tpu.vector_store %arg9[%c0_6, %c0_7], %9 {strides = array<i32>} : memref<16x256xbf16, #tpu.memory_space<vmem>>, vector<16x256xbf16>,
    return
  }
  func.func @transform_0(%arg0: i32, %arg1: i32) -> (i32, i32) {
    %c0_i32 = arith.constant 0 : i32
    %c0_i32_0 = arith.constant 0 : i32
    return %arg0, %c0_i32 : i32, i32
  }
  func.func @transform_1(%arg0: i32, %arg1: i32) -> (i32, i32) {
    %c0_i32 = arith.constant 0 : i32
    %c0_i32_0 = arith.constant 0 : i32
    %c0_i32_1 = arith.constant 0 : i32
    return %c0_i32, %c0_i32_0 : i32, i32
  }
  func.func @transform_2(%arg0: i32, %arg1: i32) -> (i32, i32) {
    %c0_i32 = arith.constant 0 : i32
    %c0_i32_0 = arith.constant 0 : i32
    %c0_i32_1 = arith.constant 0 : i32
    return %c0_i32, %c0_i32_0 : i32, i32
  }
  func.func @transform_3(%arg0: i32, %arg1: i32) -> (i32, i32) {
    %c0_i32 = arith.constant 0 : i32
    %c0_i32_0 = arith.constant 0 : i32
    %c0_i32_1 = arith.constant 0 : i32
    return %c0_i32, %c0_i32_0 : i32, i32
  }
  func.func @transform_4(%arg0: i32, %arg1: i32) -> (i32, i32) {
    %c0_i32 = arith.constant 0 : i32
    %c0_i32_0 = arith.constant 0 : i32
    %c0_i32_1 = arith.constant 0 : i32
    return %c0_i32, %c0_i32_0 : i32, i32
  }
  func.func @transform_5(%arg0: i32, %arg1: i32) -> (i32, i32) {
    %c0_i32 = arith.constant 0 : i32
    %c0_i32_0 = arith.constant 0 : i32
    return %c0_i32, %arg1 : i32, i32
  }
  func.func @transform_6(%arg0: i32, %arg1: i32) -> (i32, i32) {
    %c0_i32 = arith.constant 0 : i32
    %c0_i32_0 = arith.constant 0 : i32
    return %c0_i32, %arg1 : i32, i32
  }
  func.func @transform_7(%arg0: i32, %arg1: i32) -> (i32, i32) {
    %c0_i32 = arith.constant 0 : i32
    return %arg0, %arg1 : i32, i32
  }
}

</mosaic_0001>

<bundles_post_ra>
// kernel: tpu_custom_call.1
= control target key start
LH: loop header
LB: loop body
LE: loop exit
PB: predicated region body
PF: predicated region fallthrough
CT: control target
= control target key end

     0   :  { %12 = vsyncpa [#allocation4], 0  ;;  %s730_s0 = inlined_call_operand.hbm [shape: bf16[16,32], index: 0, kind: input, shape index: {}]   ;;  %s731_s1 = inlined_call_operand.hbm [shape: bf16[32,32], index: 1, kind: input, shape index: {}]   ;;  %s732_s2 = inlined_call_operand.vmem [shape: f32[1,32], index: 2, kind: input, shape index: {}]   ;;  %s733_s3 = inlined_call_operand.hbm [shape: f32[1,32], index: 3, kind: input, shape index: {}]   ;;  %s734_s4 = inlined_call_operand.hbm [shape: f32[1,32], index: 4, kind: input, shape index: {}]   ;;  %s735_s5 = inlined_call_operand.hbm [shape: bf16[32,256], index: 5, kind: input, shape index: {}]   ;;  %s736_s6 = inlined_call_operand.vmem [shape: f32[1,256], index: 6, kind: input, shape index: {}]   ;;  %s737_s7 = inlined_call_operand.hbm [shape: bf16[16,256], index: 7, kind: output, shape index: {}]  }
   0x1   :  { %13 = vsyncpa [#allocation7], 0 }
   0x2   :  { %14 = vsyncpa [#allocation10], 0 }
   0x3   :  { %15 = vsyncpa [#allocation5], 0  ;;  %s33_s26 = sshll.u32 %s731_s1, 4  ;;  %s618_s27 = smov [#allocation6]   ;;  %s34_s26 = int_to_ptr.hbm [resolvable:$true] %s33_s26 }
   0x4   :  { %s35_s28 = sshll.u32 %s618_s27, 4  ;;  %s60_s8 = sshll.u32 %s734_s4, 4  ;;  %s36_s28 = int_to_ptr.vmem [resolvable:$true] %s35_s28  ;;  %s61_s8 = int_to_ptr.hbm [resolvable:$true] %s60_s8 }
   0x5   :  { %s619_s9 = smov 64   ;;  %s620_s10 = smov 4  }
   0x6   :  { %41 = dma.hbm_to_vmem [thread:$0]  %s34_s26, 256, %s36_s28, [#allocation7], %s619_s9, %s619_s9, %s620_s10  }
   0x7   :  { %s621_s11 = smov [#allocation9]   ;;  %s20_s15 = sshll.u32 %s730_s0, 4  ;;  %s21_s15 = int_to_ptr.hbm [resolvable:$true] %s20_s15 }
   0x8   :  { %s62_s12 = sshll.u32 %s621_s11, 4  ;;  %s49_s17 = sshll.u32 %s733_s3, 4  ;;  %s63_s12 = int_to_ptr.vmem [resolvable:$true] %s62_s12  ;;  %s50_s17 = int_to_ptr.hbm [resolvable:$true] %s49_s17 }
   0x9   :  { %65 = dma.hbm_to_vmem [thread:$0]  %s61_s8, 16, %s63_s12, [#allocation10]  }
   0xa   :  { %s622_s18 = smov [#allocation3]   ;;  %s623_s4 = smov [#allocation8]  }
   0xb   :  { %s22_s19 = sshll.u32 %s622_s18, 4  ;;  %s51_s20 = sshll.u32 %s623_s4, 4  ;;  %s23_s19 = int_to_ptr.vmem [resolvable:$true] %s22_s19  ;;  %s52_s20 = int_to_ptr.vmem [resolvable:$true] %s51_s20 }
   0xc   :  { %28 = dma.hbm_to_vmem [thread:$0]  %s21_s15, 128, %s23_s19, [#allocation4], %s619_s9, %s619_s9, %s620_s10  }
   0xd   :  { %s70_s23 = sshll.u32 %s735_s5, 4  ;;  %s624_s0 = smov [#allocation11]   ;;  %s71_s23 = int_to_ptr.hbm [resolvable:$true] %s70_s23 }
   0xe   :  { %54 = dma.hbm_to_vmem [thread:$0]  %s50_s17, 16, %s52_s20, [#allocation7]  }
   0xf   :  { %s72_s24 = sshll.u32 %s624_s0, 4  ;;  %s625_s25 = smov 128   ;;  %s73_s24 = int_to_ptr.vmem [resolvable:$true] %s72_s24 }
  0x10   :  { %s626_s26 = smov 8  }
  0x11   :  { %78 = dma.hbm_to_vmem [thread:$0]  %s71_s23, 512, %s73_s24, [#allocation10], %s625_s25, %s625_s25, %s626_s26  }
  0x12   :  { %610 = dma.done.wait [#allocation4], 128  }
  0x13   :  { %611 = vsyncadd [#allocation4], 4294967168 }
  0x14   :  { %612 = dma.done.wait [#allocation7], 272  }
  0x15   :  { %613 = vsyncadd [#allocation7], 4294967024 }
  0x16   :  { %614 = dma.done.wait [#allocation10], 528  }
  0x17   :  { %615 = vsyncadd [#allocation10], 4294966768  ;;  %v439_v0 = vld [vmem:[#allocation6 + $0x8] sm:$0xff]  ;;  %v438_v1 = vld [vmem:[#allocation6] sm:$0xff]  ;;  %vm133_vm0 = vcmask 261120   ;;  %vm303_vm13 = vcmask 257024  }
  0x18   :  { %143 = vmatpush.bf16.msra.mxu0 %v439_v0  ;;  %v437_v2 = vld [vmem:[#allocation3] sm:$0xff]  ;;  %v455_v3 = vld [vmem:[%s732_s2] ss:$0 sm:$0xff]  ;;  %s627_s28 = smov [#allocation12]   ;;  %s385_s9 = sshll.u32 %s737_s7, 4  ;;  %s386_s9 = int_to_ptr.hbm [resolvable:$true] %s385_s9 }
  0x19   :  { %s383_s29 = sshll.u32 %s627_s28, 4  ;;  %s384_s29 = int_to_ptr.vmem [resolvable:$true] %s383_s29 }
  0x1c   :  { %144 = vmatpush.bf16.msra.mxu0 %v438_v1 }
  0x1f   :  { %412 = vmatmul.msk.bf16.vlgmr.msra.gmra.mxu0 %vm133_vm0, %v437_v2 }
  0x9c   :  { %v146_v4 = vpop.f32.mrf.mxu0 }
  0x9d   :  { %v690_v5 = vadd.f32 %v455_v3, %v146_v4 }
  0x9f   :  { %v153_v6 = vmul.f32 0.70710677, %v690_v5 }
  0xa1   :  { %v155_v7 = vmul.f32 %v153_v6, %v153_v6 }
  0xa3   :  { %v156_v8 = vmin.f32 %v155_v7, 16.0 }
  0xa4   :  { %v148_v9 = vpop.f32.mrf.mxu0 }
  0xa5   :  { %v157_v10 = vmul.f32 2.1237322e-06, %v156_v8  ;;  %v168_v11 = vmul.f32 3.8918573e-05, %v156_v8  ;;  %v693_v12 = vadd.f32 %v455_v3, %v148_v9 }
  0xa7   :  { %v158_v13 = vadd.f32 0.00028619796, %v157_v10  ;;  %v169_v14 = vadd.f32 0.001143296, %v168_v11  ;;  %v696_v15 = vmul.f32 0.70710677, %v693_v12 }
  0xa8   :  { %v151_v11 = vmul.f32 0.5, %v690_v5 }
  0xa9   :  { %v159_v16 = vmul.f32 %v158_v13, %v156_v8  ;;  %v170_v17 = vmul.f32 %v169_v14, %v156_v8  ;;  %v195_v18 = vmul.f32 %v696_v15, %v696_v15 }
  0xab   :  { %v171_v19 = vadd.f32 0.014752088, %v170_v17  ;;  %v160_v20 = vadd.f32 0.0036580483, %v159_v16  ;;  %v196_v21 = vmin.f32 %v195_v18, 16.0 }
  0xad   :  { %v172_v22 = vmul.f32 %v171_v19, %v156_v8  ;;  %v197_v23 = vmul.f32 2.1237322e-06, %v196_v21  ;;  %v208_v24 = vmul.f32 3.8918573e-05, %v196_v21  ;;  %v161_v26 = vmul.f32 %v160_v20, %v156_v8 }
  0xaf   :  { %v173_v25 = vadd.f32 0.112945676, %v172_v22  ;;  %v198_v27 = vadd.f32 0.00028619796, %v197_v23  ;;  %v209_v28 = vadd.f32 0.001143296, %v208_v24 }
  0xb0   :  { %v162_v33 = vadd.f32 0.05243302, %v161_v26  ;;  %v152_v24 = vmul.f32 0.5, %v693_v12 }
  0xb1   :  { %v174_v29 = vmul.f32 %v173_v25, %v156_v8  ;;  %v199_v30 = vmul.f32 %v198_v27, %v196_v21  ;;  %v210_v31 = vmul.f32 %v209_v28, %v196_v21 }
  0xb2   :  { %v163_v39 = vmul.f32 %v162_v33, %v156_v8 }
  0xb3   :  { %v175_v32 = vadd.f32 0.4994258, %v174_v29  ;;  %v211_v34 = vadd.f32 0.014752088, %v210_v31  ;;  %v200_v36 = vadd.f32 0.0036580483, %v199_v30 }
  0xb4   :  { %v164_v43 = vadd.f32 0.18741608, %v163_v39 }
  0xb5   :  { %v176_v35 = vmul.f32 %v175_v32, %v156_v8  ;;  %v212_v37 = vmul.f32 %v211_v34, %v196_v21  ;;  %v201_v41 = vmul.f32 %v200_v36, %v196_v21 }
  0xb6   :  { %v165_v48 = vmul.f32 %v164_v43, %v156_v8  ;;  %v444_v43 = vld [vmem:[#allocation11 + $0x14] sm:$0xf0] }
  0xb7   :  { %v177_v38 = vadd.f32 1.0, %v176_v35  ;;  %v213_v40 = vadd.f32 0.112945676, %v212_v37  ;;  %v202_v45 = vadd.f32 0.05243302, %v201_v41 }
  0xb8   :  { %v166_v54 = vadd.f32 1.1283791, %v165_v48  ;;  %v442_v48 = vld [vmem:[#allocation11 + $0x4] sm:$0xf0] }
  0xb9   :  { %458 = vrcp.f32 %v177_v38  ;;  %v214_v42 = vmul.f32 %v213_v40, %v196_v21  ;;  %v203_v51 = vmul.f32 %v202_v45, %v196_v21  ;;  %v189_v53 = vand.u32 2147483648, %v177_v38 }
  0xba   :  { %v187_v56 = vand.u32 2147483647, %v177_v38  ;;  %vm183_vm2 = vweird.f32 %v177_v38  ;;  %v167_v61 = vmul.f32 %v166_v54, %v153_v6 }
  0xbb   :  { %v215_v44 = vadd.f32 0.4994258, %v214_v42  ;;  %v204_v57 = vadd.f32 0.18741608, %v203_v51  ;;  %v190_v59 = vor.u32 1.1754944e-38, %v189_v53 }
  0xbc   :  { %vm188_vm4 = vcmp.eq.f32.partialorder %v187_v56, 8.507059e+37  ;;  %v429_v42 = vld [vmem:[#allocation11 + $0x10] sm:$0xf]  ;;  %v441_v51 = vld [vmem:[#allocation11 + $0x4] sm:$0xf] }
  0xbd   :  { %v216_v46 = vmul.f32 %v215_v44, %v196_v21  ;;  %v205_v0 = vmul.f32 %v204_v57, %v196_v21  ;;  %v443_v44 = vld [vmem:[#allocation11 + $0x14] sm:$0xf]  ;;  %v430_v45 = vor.u32 %v444_v43, %v429_v42 }
  0xbf   :  { %v459_v47 = vpop.eup %458  ;;  %v217_v50 = vadd.f32 1.0, %v216_v46  ;;  %v206_v8 = vadd.f32 1.1283791, %v205_v0  ;;  %v431_v46 = vld [vmem:[#allocation11 + $0x18] sm:$0xf0]  ;;  %353 = vmatpush.bf16.msra.mxu1 %v430_v45 }
  0xc0   :  { %v179_v49 = vmul.f32 %v459_v47, %v177_v38  ;;  %vm184_vm1 = vweird.f32 %v459_v47  ;;  %v456_v0 = vld [vmem:[#allocation8] ss:$0 sm:$0xff] }
  0xc1   :  { %460 = vrcp.f32 %v217_v50  ;;  %vm185_vm3 = vmor %vm183_vm2, %vm184_vm1  ;;  %v229_v4 = vand.u32 2147483648, %v217_v50  ;;  %v227_v10 = vand.u32 2147483647, %v217_v50  ;;  %vm223_vm6 = vweird.f32 %v217_v50 }
  0xc2   :  { %v180_v52 = vsub.f32 1.0, %v179_v49  ;;  %v207_v17 = vmul.f32 %v206_v8, %v696_v15 }
  0xc3   :  { %v230_v6 = vor.u32 1.1754944e-38, %v229_v4  ;;  %vm228_vm8 = vcmp.eq.f32.partialorder %v227_v10, 8.507059e+37 }
  0xc4   :  { %v181_v55 = vmul.f32 %v459_v47, %v180_v52  ;;  %v423_v52 = vld [vmem:[#allocation11 + $0x8] sm:$0xf0] }
  0xc5   :  { %v426_v57 = vor.u32 %v441_v51, %v423_v52 }
  0xc6   :  { %v182_v58 = vadd.f32 %v459_v47, %v181_v55 }
  0xc7   :  { %v461_v60 = vpop.eup %460 }
  0xc8   :  { %v186_v62 = vsel %vm185_vm3, %v459_v47, %v182_v58  ;;  %v219_v1 = vmul.f32 %v461_v60, %v217_v50  ;;  %vm224_vm5 = vweird.f32 %v461_v60  ;;  %v421_v47 = vld [vmem:[#allocation11] sm:$0xf]  ;;  %v434_v50 = vor.u32 %v443_v44, %v431_v46 }
  0xc9   :  { %v191_v63 = vsel %vm188_vm4, %v190_v59, %v186_v62  ;;  %vm225_vm7 = vmor %vm223_vm6, %vm224_vm5  ;;  %v422_v54 = vor.u32 %v442_v48, %v421_v47 }
  0xca   :  { %v192_v2 = vmul.f32 %v191_v63, %v167_v61  ;;  %v220_v3 = vsub.f32 1.0, %v219_v1  ;;  %367 = vmatpush.bf16.msra.mxu2 %v434_v50 }
  0xcb   :  { %354 = vmatpush.bf16.msra.mxu1 %v422_v54 }
  0xcc   :  { %v413_v7 = vclamps-f32 %v192_v2, 1.0  ;;  %v221_v9 = vmul.f32 %v461_v60, %v220_v3  ;;  %v457_v3 = vld [vmem:[#allocation9] ss:$0 sm:$0xff] }
  0xce   :  { %v235_v13 = vadd.f32 1.0, %v413_v7  ;;  %v222_v14 = vadd.f32 %v461_v60, %v221_v9  ;;  %368 = vmatpush.bf16.msra.mxu2 %v426_v57 }
  0xd0   :  { %v701_v16 = vmul.f32 %v235_v13, %v151_v11  ;;  %v226_v18 = vsel %vm225_vm7, %v461_v60, %v222_v14 }
  0xd1   :  { %v231_v19 = vsel %vm228_vm8, %v230_v6, %v226_v18 }
  0xd2   :  { %v239_v20 = vsel %vm133_vm0, %v701_v16, 0.0  ;;  %v245_v21 = vmul.f32 %v701_v16, %v701_v16  ;;  %v232_v22 = vmul.f32 %v231_v19, %v207_v17 }
  0xd3   :  { %240 = vadd.xlane.f32.xlu0 %v239_v20 }
  0xd4   :  { %v247_v5 = vsel %vm133_vm0, %v245_v21, 0.0  ;;  %v414_v23 = vclamps-f32 %v232_v22, 1.0  ;;  %v312_v22 = vld [vmem:[%s736_s6] sm:$0x3] }
  0xd5   :  { %248 = vadd.xlane.f32.xlu1 %v247_v5 }
  0xd6   :  { %v236_v25 = vadd.f32 1.0, %v414_v23  ;;  %v314_v23 = vperm.slane %v312_v22, 0 }
  0xd8   :  { %v710_v26 = vmul.f32 %v236_v25, %v152_v24  ;;  %v315_v24 = vperm.slane %v312_v22, 1 }
  0xda   :  { %v242_v15 = vsel %vm133_vm0, %v710_v26, 0.0  ;;  %v246_v27 = vmul.f32 %v710_v26, %v710_v26 }
  0xdb   :  { %243 = vadd.xlane.f32.xlu0 %v242_v15 }
  0xdc   :  { %v250_v28 = vsel %vm133_vm0, %v246_v27, 0.0 }
  0xdd   :  { %251 = vadd.xlane.f32.xlu1 %v250_v28 }
 0x146   :  { %v241_v29 = vpop.xlane.xlu0 %240 }
 0x147   :  { %v253_v30 = vmul.f32 0.03125, %v241_v29 }
 0x148   :  { %v249_v31 = vpop.xlane.xlu1 %248 }
 0x149   :  { %v257_v32 = vmul.f32 %v253_v30, %v253_v30  ;;  %v255_v33 = vmul.f32 0.03125, %v249_v31  ;;  %v263_v63 = vsub.f32 %v701_v16, %v253_v30 }
 0x14b   :  { %v259_v34 = vsub.f32 %v255_v33, %v257_v32 }
 0x14d   :  { %v261_v12 = vmax.f32 %v259_v34, 0.0 }
 0x14e   :  { %v244_v36 = vpop.xlane.xlu0 %243 }
 0x14f   :  { %v265_v35 = vadd.f32 1e-05, %v261_v12  ;;  %v254_v37 = vmul.f32 0.03125, %v244_v36 }
 0x150   :  { %v252_v38 = vpop.xlane.xlu1 %251 }
 0x151   :  { %462 = vrsqrt.f32 %v265_v35  ;;  %v258_v39 = vmul.f32 %v254_v37, %v254_v37  ;;  %v256_v40 = vmul.f32 0.03125, %v252_v38  ;;  %vm273_vm10 = vweird.f32 %v265_v35 }
 0x152   :  { %v264_v6 = vsub.f32 %v710_v26, %v254_v37 }
 0x153   :  { %v260_v41 = vsub.f32 %v256_v40, %v258_v39 }
 0x155   :  { %v262_v49 = vmax.f32 %v260_v41, 0.0 }
 0x157   :  { %v463_v53 = vpop.eup %462  ;;  %v266_v56 = vadd.f32 1e-05, %v262_v49 }
 0x158   :  { %v268_v55 = vmul.f32 %v463_v53, %v265_v35  ;;  %vm274_vm9 = vweird.f32 %v463_v53 }
 0x159   :  { %464 = vrsqrt.f32 %v266_v56  ;;  %vm275_vm11 = vmor %vm273_vm10, %vm274_vm9  ;;  %vm283_vm14 = vweird.f32 %v266_v56 }
 0x15a   :  { %v269_v58 = vmul.f32 %v463_v53, %v268_v55 }
 0x15c   :  { %v270_v59 = vmul.f32 0.5, %v269_v58 }
 0x15e   :  { %v271_v60 = vsub.f32 1.5, %v270_v59 }
 0x15f   :  { %v465_v61 = vpop.eup %464 }
 0x160   :  { %v272_v62 = vmul.f32 %v463_v53, %v271_v60  ;;  %v278_v1 = vmul.f32 %v465_v61, %v266_v56  ;;  %vm284_vm12 = vweird.f32 %v465_v61 }
 0x161   :  { %vm285_vm15 = vmor %vm283_vm14, %vm284_vm12 }
 0x162   :  { %v276_v2 = vsel %vm275_vm11, %v463_v53, %v272_v62  ;;  %v279_v7 = vmul.f32 %v465_v61, %v278_v1 }
 0x163   :  { %v287_v4 = vmul.f32 %v276_v2, %v263_v63 }
 0x164   :  { %v280_v9 = vmul.f32 0.5, %v279_v7 }
 0x165   :  { %v293_v8 = vmul.f32 %v456_v0, %v287_v4 }
 0x166   :  { %v281_v11 = vsub.f32 1.5, %v280_v9 }
 0x167   :  { %v299_v10 = vadd.f32 %v457_v3, %v293_v8 }
 0x168   :  { %v282_v14 = vmul.f32 %v465_v61, %v281_v11 }
 0x169   :  { %v301_v13 = vpack.c.bf16 %v299_v10, %v299_v10 }
 0x16a   :  { %v286_v16 = vsel %vm285_vm15, %v465_v61, %v282_v14 }
 0x16b   :  { %304 = vst.msk [vmem:[#allocation2] sm:$0xf] %vm303_vm13, %v301_v13  ;;  %v288_v17 = vmul.f32 %v286_v16, %v264_v6 }
 0x16d   :  { %v294_v18 = vmul.f32 %v456_v0, %v288_v17 }
 0x16f   :  { %v300_v19 = vadd.f32 %v457_v3, %v294_v18 }
 0x171   :  { %v302_v20 = vpack.c.bf16 %v300_v19, %v300_v19 }
 0x173   :  { %305 = vst.msk [vmem:[#allocation2 + $0x4] sm:$0xf] %vm303_vm13, %v302_v20 }
 0x17a   :  { %v440_v21 = vld [vmem:[#allocation2] sm:$0xff] }
 0x17b   :  { %435 = vmatmul.msk.bf16.vlgmr.msra.gmra.mxu1 %vm133_vm0, %v440_v21  ;;  %436 = vmatmul.msk.bf16.vlgmr.msra.gmra.mxu2 %vm133_vm0, %v440_v21 }
 0x1f8   :  { %v356_v5 = vpop.f32.mrf.mxu1 }
 0x1f9   :  { %v357_v26 = vadd.f32 %v356_v5, %v314_v23 }
 0x1fe   :  { %v370_v25 = vpop.f32.mrf.mxu2 }
 0x1ff   :  { %v371_v15 = vadd.f32 %v370_v25, %v315_v24 }
 0x200   :  { %v358_v28 = vpop.f32.mrf.mxu1 }
 0x201   :  { %v375_v27 = vpack.c.bf16 %v371_v15, %v357_v26  ;;  %v359_v30 = vadd.f32 %v358_v28, %v314_v23 }
 0x203   :  { %377 = vst [vmem:[#allocation12] sm:$0xff] %v375_v27 }
 0x206   :  { %v372_v29 = vpop.f32.mrf.mxu2 }
 0x207   :  { %v373_v31 = vadd.f32 %v372_v29, %v315_v24 }
 0x209   :  { %v376_v32 = vpack.c.bf16 %v373_v31, %v359_v30 }
 0x20b   :  { %378 = vst [vmem:[#allocation12 + $0x8] sm:$0xff] %v376_v32 }
 0x20c   :  { %391 = dma.vmem_to_hbm [thread:$0]  %s384_s29, 256, %s386_s9, [#allocation5], %s625_s25, %s625_s25, %s626_s26  }
 0x20d   :  { %616 = dma.done.wait [#allocation5], 256  }
 0x20e   :  { %617 = vsyncadd [#allocation5], 4294967040 }
 0x20f   :  { %396 = vsyncpa [#allocation4], 1 }
 0x210   :  { %397 = vsyncpa [#allocation7], 1 }
 0x211   :  { %398 = vsyncpa [#allocation10], 1 }
 0x212   :  { %399 = vsyncpa [#allocation5], 1 }

</bundles_post_ra>
